<compile_context>
chip_gen: v6e
topology: v6e:2x2x1
jax: 0.10.0
libtpu: 0.0.40
codegen_flags: <defaults>
</compile_context>

<pallas_src>
import jax
import jax.numpy as jnp
from jax import lax
from jax.experimental import pallas as pl
from jax.experimental.pallas import tpu as pltpu


D_IN, D_H, D_Z = 31, 16, 2


# ----------------------------------------------------------------------------
# Fused Pallas kernel: encoder + decoder, batch on the lane axis throughout
# ----------------------------------------------------------------------------
def _autoencoder_kernel(x_ref, w1_ref, b1_ref, w2_ref, b2_ref,
                        w3_ref, b3_ref, w4t_ref, b4_ref, o_ref):
    x = x_ref[...]                                            # (tm, 31)

    # Encoder layer 1: h = relu(W1 @ x^T + b1) -> (16, tm)
    # Contract the feature axis of both operands (A @ B^T form).
    h = lax.dot_general(w1_ref[...], x, (((1,), (1,)), ((), ())),
                        preferred_element_type=jnp.float32)
    h = jnp.maximum(h + b1_ref[...], 0.0)

    # Encoder layer 2: z = tanh(W2 @ h + b2) -> (2, tm)
    z = jnp.tanh(jnp.dot(w2_ref[...], h, preferred_element_type=jnp.float32)
                 + b2_ref[...])

    # Decoder layer 1: g = relu(W3 @ z + b3) -> (16, tm)
    g = jnp.maximum(jnp.dot(w3_ref[...], z, preferred_element_type=jnp.float32)
                    + b3_ref[...], 0.0)

    # Decoder layer 2: y = (W4 @ g)^T + b4, produced directly batch-major.
    # Contract the hidden axis (lhs dim 0, rhs dim 0 of W4^T) -> (tm, 31).
    y = lax.dot_general(g, w4t_ref[...], (((0,), (0,)), ((), ())),
                        preferred_element_type=jnp.float32)
    o_ref[...] = y + b4_ref[...]


# ----------------------------------------------------------------------------
# Wrapper: 1-D grid over batch rows, no input padding, weights VMEM-resident
# ----------------------------------------------------------------------------
def autoencoder_forward(params, x, *, block_m=2048):
    n, d = x.shape
    assert d == D_IN, f"expected {D_IN} input features, got {d}"
    assert block_m % 8 == 0, "block_m must be a multiple of 8 sublanes"
    x = x.astype(jnp.float32)

    # Row tile: big tiles amortize per-step overhead.  For small batches the
    # single block equals the full batch dim (always a legal block shape).
    tm = block_m if n >= block_m else n
    grid_m = pl.cdiv(n, tm)   # partial final block is masked by Pallas

    # Kernel-friendly layouts (tiny host-side reshapes/transposes of params).
    w1 = params["w1"]                      # (16, 31)  (out, in)
    w2 = params["w2"]                      # (2, 16)
    w3 = params["w3"]                      # (16, 2)
    w4t = params["w4"].T                   # (16, 31)  = W4^T
    b1 = params["b1"].reshape(D_H, 1)      # broadcast over lanes
    b2 = params["b2"].reshape(D_Z, 1)
    b3 = params["b3"].reshape(D_H, 1)
    b4 = params["b4"].reshape(1, D_IN)     # broadcast over sublanes

    def full(a):
        # Whole-array block, VMEM-resident, reused by every grid step.
        return pl.BlockSpec(a.shape, lambda i: (0,) * a.ndim)

    param_bytes = 4 * (w1.size + w2.size + w3.size + w4t.size
                       + b1.size + b2.size + b3.size + b4.size)
    cost = pl.CostEstimate(
        flops=2 * n * (D_IN * D_H + D_H * D_Z + D_Z * D_H + D_H * D_IN),
        transcendentals=n * D_Z,
        bytes_accessed=2 * n * D_IN * 4 + param_bytes,
    )

    return pl.pallas_call(
        _autoencoder_kernel,
        out_shape=jax.ShapeDtypeStruct((n, D_IN), jnp.float32),
        grid=(grid_m,),
        in_specs=[pl.BlockSpec((tm, D_IN), lambda i: (i, 0)),
                  full(w1), full(b1), full(w2), full(b2),
                  full(w3), full(b3), full(w4t), full(b4)],
        out_specs=pl.BlockSpec((tm, D_IN), lambda i: (i, 0)),
        compiler_params=pltpu.CompilerParams(
            dimension_semantics=("parallel",)),
        cost_estimate=cost,
    )(x, w1, b1, w2, b2, w3, b3, w4t, b4)


# ----------------------------------------------------------------------------
# Parameters (deterministic synthetic init; PyTorch (out, in) layout)
# ----------------------------------------------------------------------------
def init_params(key):
    ks = jax.random.split(key, 8)

    def lin(kw, kb, fan_in, fan_out):
        # Matches nn.Linear default U(-1/sqrt(fan_in), 1/sqrt(fan_in)).
        bound = 1.0 / (fan_in ** 0.5)
        w = jax.random.uniform(kw, (fan_out, fan_in), jnp.float32, -bound, bound)
        b = jax.random.uniform(kb, (fan_out,), jnp.float32, -bound, bound)
        return w, b

    p = {}
    p["w1"], p["b1"] = lin(ks[0], ks[1], D_IN, D_H)   # Encoder Linear(31,16)
    p["w2"], p["b2"] = lin(ks[2], ks[3], D_H, D_Z)    # Encoder Linear(16,2)
    p["w3"], p["b3"] = lin(ks[4], ks[5], D_Z, D_H)    # Decoder Linear(2,16)
    p["w4"], p["b4"] = lin(ks[6], ks[7], D_H, D_IN)   # Decoder Linear(16,31)
    return p


def autoencoder_reference(params, x):
    # Pure-JAX reference (PyTorch semantics: x @ W^T + b).
    h = jnp.maximum(x @ params["w1"].T + params["b1"], 0.0)
    z = jnp.tanh(h @ params["w2"].T + params["b2"])
    g = jnp.maximum(z @ params["w3"].T + params["b3"], 0.0)
    return g @ params["w4"].T + params["b4"]


if __name__ == "__main__":
    key = jax.random.PRNGKey(0)
    pkey, xkey1, xkey2 = jax.random.split(key, 3)
    params = init_params(pkey)

    # Small batch matching forward(x: (N, 31)).
    x_small = jax.random.normal(xkey1, (8, D_IN), jnp.float32)
    y_small = jax.jit(autoencoder_forward)(params, x_small)
    jax.block_until_ready(y_small)
    assert y_small.shape == (8, D_IN), y_small.shape
    assert bool(jnp.all(jnp.isfinite(y_small)))
    ref_small = autoencoder_reference(params, x_small)
    assert bool(jnp.allclose(y_small, ref_small, atol=1e-5, rtol=1e-5)), \
        float(jnp.max(jnp.abs(y_small - ref_small)))

    # Multi-tile path: grid > 1 with a partial (masked) final block.
    x_big = jax.random.normal(xkey2, (300, D_IN), jnp.float32)
    fwd_big = jax.jit(lambda p, x: autoencoder_forward(p, x, block_m=128))
    y_big = fwd_big(params, x_big)
    jax.block_until_ready(y_big)
    ref_big = autoencoder_reference(params, x_big)
    assert y_big.shape == (300, D_IN), y_big.shape
    assert bool(jnp.allclose(y_big, ref_big, atol=1e-5, rtol=1e-5)), \
        float(jnp.max(jnp.abs(y_big - ref_big)))

    print("KERNEL_OK")
</pallas_src>

<mosaic_0001>
module attributes {stable_mosaic.version = 11 : i64} {
  func.func @_autoencoder_kernel(%arg0: i32, %arg1: memref<8x31xf32, #tpu.memory_space<vmem>>, %arg2: memref<16x31xf32, #tpu.memory_space<vmem>>, %arg3: memref<16x1xf32, #tpu.memory_space<vmem>>, %arg4: memref<2x16xf32, #tpu.memory_space<vmem>>, %arg5: memref<2x1xf32, #tpu.memory_space<vmem>>, %arg6: memref<16x2xf32, #tpu.memory_space<vmem>>, %arg7: memref<16x1xf32, #tpu.memory_space<vmem>>, %arg8: memref<16x31xf32, #tpu.memory_space<vmem>>, %arg9: memref<1x31xf32, #tpu.memory_space<vmem>>, %arg10: memref<8x31xf32, #tpu.memory_space<vmem>>) attributes {dimension_semantics = [#tpu.dimension_semantics<parallel>], iteration_bounds = array<i64: 1>, scalar_prefetch = 0 : i64, scratch_operands = 0 : i64, tpu.core_type = #tpu.core_type<tc>, window_params = [{transform_indices = @transform_0, window_bounds = array<i64: 8, 31>}, {pipeline_mode = #tpu.pipeline_mode<synchronous>, transform_indices = @transform_1, window_bounds = array<i64: 16, 31>}, {pipeline_mode = #tpu.pipeline_mode<synchronous>, transform_indices = @transform_2, window_bounds = array<i64: 16, 1>}, {pipeline_mode = #tpu.pipeline_mode<synchronous>, transform_indices = @transform_3, window_bounds = array<i64: 2, 16>}, {pipeline_mode = #tpu.pipeline_mode<synchronous>, transform_indices = @transform_4, window_bounds = array<i64: 2, 1>}, {pipeline_mode = #tpu.pipeline_mode<synchronous>, transform_indices = @transform_5, window_bounds = array<i64: 16, 2>}, {pipeline_mode = #tpu.pipeline_mode<synchronous>, transform_indices = @transform_6, window_bounds = array<i64: 16, 1>}, {pipeline_mode = #tpu.pipeline_mode<synchronous>, transform_indices = @transform_7, window_bounds = array<i64: 16, 31>}, {pipeline_mode = #tpu.pipeline_mode<synchronous>, transform_indices = @transform_8, window_bounds = array<i64: 1, 31>}, {transform_indices = @transform_9, window_bounds = array<i64: 8, 31>}]} {
    %c0 = arith.constant 0 : index
    %c0_0 = arith.constant 0 : index
    %0 = vector.load %arg1[%c0, %c0_0] : memref<8x31xf32, #tpu.memory_space<vmem>>, vector<8x31xf32>
    %c0_1 = arith.constant 0 : index
    %c0_2 = arith.constant 0 : index
    %1 = vector.load %arg2[%c0_1, %c0_2] : memref<16x31xf32, #tpu.memory_space<vmem>>, vector<16x31xf32>
    %cst = arith.constant dense<0.000000e+00> : vector<16x8xf32>
    %2 = tpu.matmul %1, %0, %cst {dimension_numbers = #tpu.dot_dimension_numbers<[1], [1], [0], [0], [0, 0, 1, 0], [], []>} : vector<16x31xf32>, vector<8x31xf32>, vector<16x8xf32> -> vector<16x8xf32>
    %c0_3 = arith.constant 0 : index
    %c0_4 = arith.constant 0 : index
    %3 = vector.load %arg3[%c0_3, %c0_4] : memref<16x1xf32, #tpu.memory_space<vmem>>, vector<16x1xf32>
    %4 = vector.broadcast %3 : vector<16x1xf32> to vector<16x8xf32>
    %5 = arith.addf %2, %4 : vector<16x8xf32>
    %cst_5 = arith.constant 0.000000e+00 : f32
    %6 = vector.broadcast %cst_5 : f32 to vector<16x8xf32>
    %7 = arith.maximumf %5, %6 : vector<16x8xf32>
    %c0_6 = arith.constant 0 : index
    %c0_7 = arith.constant 0 : index
    %8 = vector.load %arg4[%c0_6, %c0_7] : memref<2x16xf32, #tpu.memory_space<vmem>>, vector<2x16xf32>
    %cst_8 = arith.constant dense<0.000000e+00> : vector<2x8xf32>
    %9 = tpu.matmul %8, %7, %cst_8 {dimension_numbers = #tpu.dot_dimension_numbers<[1], [0], [0], [1], [0, 0, 1, 1], [], []>} : vector<2x16xf32>, vector<16x8xf32>, vector<2x8xf32> -> vector<2x8xf32>
    %c0_9 = arith.constant 0 : index
    %c0_10 = arith.constant 0 : index
    %10 = vector.load %arg5[%c0_9, %c0_10] : memref<2x1xf32, #tpu.memory_space<vmem>>, vector<2x1xf32>
    %11 = vector.broadcast %10 : vector<2x1xf32> to vector<2x8xf32>
    %12 = arith.addf %9, %11 : vector<2x8xf32>
    %13 = math.tanh %12 : vector<2x8xf32>
    %c0_11 = arith.constant 0 : index
    %c0_12 = arith.constant 0 : index
    %14 = vector.load %arg6[%c0_11, %c0_12] : memref<16x2xf32, #tpu.memory_space<vmem>>, vector<16x2xf32>
    %cst_13 = arith.constant dense<0.000000e+00> : vector<16x8xf32>
    %15 = tpu.matmul %14, %13, %cst_13 {dimension_numbers = #tpu.dot_dimension_numbers<[1], [0], [0], [1], [0, 0, 1, 1], [], []>} : vector<16x2xf32>, vector<2x8xf32>, vector<16x8xf32> -> vector<16x8xf32>
    %c0_14 = arith.constant 0 : index
    %c0_15 = arith.constant 0 : index
    %16 = vector.load %arg7[%c0_14, %c0_15] : memref<16x1xf32, #tpu.memory_space<vmem>>, vector<16x1xf32>
    %17 = vector.broadcast %16 : vector<16x1xf32> to vector<16x8xf32>
    %18 = arith.addf %15, %17 : vector<16x8xf32>
    %cst_16 = arith.constant 0.000000e+00 : f32
    %19 = vector.broadcast %cst_16 : f32 to vector<16x8xf32>
    %20 = arith.maximumf %18, %19 : vector<16x8xf32>
    %c0_17 = arith.constant 0 : index
    %c0_18 = arith.constant 0 : index
    %21 = vector.load %arg8[%c0_17, %c0_18] : memref<16x31xf32, #tpu.memory_space<vmem>>, vector<16x31xf32>
    %cst_19 = arith.constant dense<0.000000e+00> : vector<8x31xf32>
    %22 = tpu.matmul %20, %21, %cst_19 {dimension_numbers = #tpu.dot_dimension_numbers<[0], [0], [1], [1], [0, 1, 1, 1], [], []>} : vector<16x8xf32>, vector<16x31xf32>, vector<8x31xf32> -> vector<8x31xf32>
    %c0_20 = arith.constant 0 : index
    %c0_21 = arith.constant 0 : index
    %23 = vector.load %arg9[%c0_20, %c0_21] : memref<1x31xf32, #tpu.memory_space<vmem>>, vector<1x31xf32>
    %24 = vector.broadcast %23 : vector<1x31xf32> to vector<8x31xf32>
    %25 = arith.addf %22, %24 : vector<8x31xf32>
    %c0_22 = arith.constant 0 : index
    %c0_23 = arith.constant 0 : index
    %26 = vector.load %arg10[%c0_22, %c0_23] : memref<8x31xf32, #tpu.memory_space<vmem>>, vector<8x31xf32>
    tpu.vector_store %arg10[%c0_22, %c0_23], %25 {strides = array<i32>} : memref<8x31xf32, #tpu.memory_space<vmem>>, vector<8x31xf32>,
    return
  }
  func.func @transform_0(%arg0: i32) -> (i32, i32) {
    %c0_i32 = arith.constant 0 : i32
    %c0_i32_0 = arith.constant 0 : i32
    return %arg0, %c0_i32 : i32, i32
  }
  func.func @transform_1(%arg0: i32) -> (i32, i32) {
    %c0_i32 = arith.constant 0 : i32
    %c0_i32_0 = arith.constant 0 : i32
    %c0_i32_1 = arith.constant 0 : i32
    return %c0_i32, %c0_i32_0 : i32, i32
  }
  func.func @transform_2(%arg0: i32) -> (i32, i32) {
    %c0_i32 = arith.constant 0 : i32
    %c0_i32_0 = arith.constant 0 : i32
    %c0_i32_1 = arith.constant 0 : i32
    return %c0_i32, %c0_i32_0 : i32, i32
  }
  func.func @transform_3(%arg0: i32) -> (i32, i32) {
    %c0_i32 = arith.constant 0 : i32
    %c0_i32_0 = arith.constant 0 : i32
    %c0_i32_1 = arith.constant 0 : i32
    return %c0_i32, %c0_i32_0 : i32, i32
  }
  func.func @transform_4(%arg0: i32) -> (i32, i32) {
    %c0_i32 = arith.constant 0 : i32
    %c0_i32_0 = arith.constant 0 : i32
    %c0_i32_1 = arith.constant 0 : i32
    return %c0_i32, %c0_i32_0 : i32, i32
  }
  func.func @transform_5(%arg0: i32) -> (i32, i32) {
    %c0_i32 = arith.constant 0 : i32
    %c0_i32_0 = arith.constant 0 : i32
    %c0_i32_1 = arith.constant 0 : i32
    return %c0_i32, %c0_i32_0 : i32, i32
  }
  func.func @transform_6(%arg0: i32) -> (i32, i32) {
    %c0_i32 = arith.constant 0 : i32
    %c0_i32_0 = arith.constant 0 : i32
    %c0_i32_1 = arith.constant 0 : i32
    return %c0_i32, %c0_i32_0 : i32, i32
  }
  func.func @transform_7(%arg0: i32) -> (i32, i32) {
    %c0_i32 = arith.constant 0 : i32
    %c0_i32_0 = arith.constant 0 : i32
    %c0_i32_1 = arith.constant 0 : i32
    return %c0_i32, %c0_i32_0 : i32, i32
  }
  func.func @transform_8(%arg0: i32) -> (i32, i32) {
    %c0_i32 = arith.constant 0 : i32
    %c0_i32_0 = arith.constant 0 : i32
    %c0_i32_1 = arith.constant 0 : i32
    return %c0_i32, %c0_i32_0 : i32, i32
  }
  func.func @transform_9(%arg0: i32) -> (i32, i32) {
    %c0_i32 = arith.constant 0 : i32
    %c0_i32_0 = arith.constant 0 : i32
    return %arg0, %c0_i32 : i32, i32
  }
}

</mosaic_0001>

<bundles_post_ra>
// kernel: autoencoder_forward.1
= control target key start
LH: loop header
LB: loop body
LE: loop exit
PB: predicated region body
PF: predicated region fallthrough
CT: control target
= control target key end

     0   :  { %vm48_vm0 = vcmask 252928   ;;  %v523_v4 = vmov 0   ;;  %s631_s0 = inlined_call_operand.vmem [shape: f32[8,31], index: 0, kind: input, shape index: {}]   ;;  %s632_s1 = inlined_call_operand.vmem [shape: f32[16,31], index: 1, kind: input, shape index: {}]   ;;  %s633_s2 = inlined_call_operand.vmem [shape: f32[16,1], index: 2, kind: input, shape index: {}]   ;;  %s634_s3 = inlined_call_operand.vmem [shape: f32[2,16], index: 3, kind: input, shape index: {}]   ;;  %s635_s4 = inlined_call_operand.vmem [shape: f32[2,1], index: 4, kind: input, shape index: {}]   ;;  %s636_s5 = inlined_call_operand.vmem [shape: f32[16,2], index: 5, kind: input, shape index: {}]   ;;  %s637_s6 = inlined_call_operand.vmem [shape: f32[16,1], index: 6, kind: input, shape index: {}]   ;;  %s638_s7 = inlined_call_operand.vmem [shape: f32[16,31], index: 7, kind: input, shape index: {}]   ;;  %s639_s8 = inlined_call_operand.vmem [shape: f32[1,31], index: 8, kind: input, shape index: {}]   ;;  %s640_s9 = inlined_call_operand.hbm [shape: f32[8,31], index: 9, kind: output, shape index: {}]  }
   0x1   :  { %v33_v0 = vld [vmem:[%s631_s0] sm:$0xff]  ;;  %v37_v2 = vld [vmem:[%s633_s2 + $0x8] sm:$0xff]  ;;  %497 = vset.pattern.permute.xlu0 %v523_v4 }
   0x2   :  { %v34_v1 = vld [vmem:[%s632_s1] sm:$0xff]  ;;  %469 = vmatprep.subr.msk.mxu0 %vm48_vm0, %v33_v0  ;;  %v35_v3 = vld [vmem:[%s632_s1 + $0x8] sm:$0xff] }
   0x3   :  { %471 = vmatprep.mubr.msk.f32.mxu0 %vm48_vm0, %v34_v1  ;;  %470 = vmatpush3.xpose.msk.msra.mxu0 %vm48_vm0, %v33_v0 }
   0x4   :  { %14 = vsyncpa [#allocation3], 0  ;;  %45 = vperm.xlu0 %497, %v37_v2   ;;  %498 = vset.pattern.permute.xlu1 %v523_v4  ;;  %v36_v5 = vld [vmem:[%s633_s2] sm:$0xff]  ;;  %v220_v6 = vld [vmem:[%s637_s6 + $0x8] sm:$0xff]  ;;  %v524_v7 = vmov 0.0   ;;  %vm525_vm1 = vmmov 0  }
   0x5   :  { %474 = vmatprep.subr.mxu1 %v524_v7  ;;  %478 = vmatprep.mubr.msk.f32.mxu1 %vm525_vm1, %v524_v7  ;;  %v136_v8 = vld [vmem:[%s635_s4] sm:$0x3]  ;;  %vm142_vm2 = vcmask 130048   ;;  %vm231_vm3 = vcmask 15360   ;;  %vm238_vm4 = vcmask 1041408   ;;  %v218_v25 = vld [vmem:[%s636_s5 + $0x8] sm:$0xff] }
   0x6   :  { %472 = vmatmul.mubr.msk.f32.vlgmr.msra.gmra.mxu0 %vm48_vm0, %v35_v3  ;;  %139 = vperm.xlu1 %498, %v136_v8   ;;  %v219_v9 = vld [vmem:[%s637_s6] sm:$0xff]  ;;  %v320_v26 = vld [vmem:[%s638_s7 + $0x8] sm:$0xff] }
   0x7   :  { %v135_v18 = vld [vmem:[%s634_s3] sm:$0x3] }
   0x8   :  { %40 = vperm.xlu0 %497, %v36_v5   ;;  %v217_v19 = vld [vmem:[%s636_s5] sm:$0xff] }
   0x9   :  { %483 = vmatprep.mubr.msk.f32.mxu0 %vm231_vm3, %v217_v19  ;;  %v319_v27 = vld [vmem:[%s638_s7] sm:$0xff]  ;;  %s526_s7 = smov [#allocation2]  }
   0xa   :  { %223 = vperm.xlu1 %498, %v219_v9   ;;  %v455_v37 = vld [vmem:[%s639_s8] ss:$0 sm:$0xff]  ;;  %s440_s30 = sshll.u32 %s526_s7, 4  ;;  %s441_s30 = int_to_ptr.vmem [resolvable:$true] %s440_s30 }
   0xb   :  { %s501_s10 = scalar_lea.vmem %s441_s30, 128  ;;  %p506_p1 = scmp.lt.s32.totalorder %s441_s30, %s441_s30 }
   0xc   :  { %228 = vperm.xlu0 %497, %v220_v6   ;;  %p502_p0 = scmp.ne.s32.totalorder %s441_s30, %s501_s10  ;;  %p507_p2 = scmp.lt.s32.totalorder %s501_s10, %s501_s10 }
   0xe   :  { %p508_p3 = por %p507_p2, %p506_p1 }
  0x10   :  { %p509_p4 = pnand %p508_p3, %p502_p0 }
  0x7f   :  { %v46_v10 = vpop.permute.xlu0 %45 }
  0x81   :  { %v140_v20 = vpop.permute.xlu1 %139 }
  0x83   :  { %v41_v13 = vpop.permute.xlu0 %40 }
  0x85   :  { %v224_v29 = vpop.permute.xlu1 %223 }
  0x87   :  { %v229_v32 = vpop.permute.xlu0 %228 }
  0xc6   :  { %v473_v11 = vpop.f32.mrf.mxu0 }
  0xc7   :  { %v130_v12 = vadd.f32 %v473_v11, %v46_v10 }
  0xc8   :  { %v124_v14 = vpop.f32.mrf.mxu0 }
  0xc9   :  { %v134_v15 = vmax.f32 %v130_v12, 0.0  ;;  %v125_v16 = vadd.f32 %v124_v14, %v41_v13 }
  0xcb   :  { %v133_v17 = vmax.f32 %v125_v16, 0.0  ;;  %475 = vmatpush3.msra.mxu1 %v134_v15 }
  0xcc   :  { %476 = vmatprep.subr.mxu1 %v524_v7 }
  0xcd   :  { %477 = vmatpush3.msra.mxu1 %v133_v17 }
  0xce   :  { %479 = vmatmul.mubr.msk.f32.vlgmr.msra.gmra.mxu1 %vm142_vm2, %v135_v18  ;;  %486 = vmatprep.subr.mxu1 %v524_v7 }
  0xcf   :  { %490 = vmatprep.mubr.msk.f32.mxu1 %vm525_vm1, %v524_v7  ;;  %487 = vmatpush3.msra.mxu1 %v320_v26 }
  0xd0   :  { %488 = vmatprep.subr.mxu1 %v524_v7 }
  0xd1   :  { %489 = vmatpush3.msra.mxu1 %v319_v27 }
 0x18e   :  { %v212_v21 = vpop.f32.mrf.mxu1 }
 0x18f   :  { %v213_v22 = vadd.f32 %v212_v21, %v140_v20 }
 0x190   :  { %v480_v23 = vpop.f32.mrf.mxu1 }
 0x191   :  { %499 = vtanh.f32 %v213_v22 }
 0x19e   :  { %v500_v24 = vpop.eup %499 }
 0x19f   :  { %481 = vmatprep.subr.msk.mxu0 %vm238_vm4, %v500_v24 }
 0x1a0   :  { %482 = vmatpush3.msk.msra.mxu0 %vm238_vm4, %v500_v24 }
 0x1a1   :  { %484 = vmatmul.mubr.msk.f32.vlgmr.msra.gmra.mxu0 %vm231_vm3, %v218_v25 }
 0x261   :  { %v485_v28 = vpop.f32.mrf.mxu0 }
 0x262   :  { %v314_v33 = vadd.f32 %v485_v28, %v229_v32 }
 0x263   :  { %v308_v30 = vpop.f32.mrf.mxu0 }
 0x264   :  { %v309_v31 = vadd.f32 %v308_v30, %v224_v29  ;;  %v318_v35 = vmax.f32 %v314_v33, 0.0 }
 0x266   :  { %v317_v34 = vmax.f32 %v309_v31, 0.0 }
 0x268   :  { %328 = vxpose.xlu1.b32.start [1/2] (short) (narrow) %v317_v34, 8 }
 0x26c   :  { %329 = vxpose.xlu1.b32.end [2/2] (short) (narrow) %v318_v35, 8 }
 0x2e4   :  { %v344_v36 = vpop.trf.xlu1 }
 0x2e5   :  { %491 = vmatmul.mubr.msk.f32.vlgmr.msra.gmra.mxu1 %vm142_vm2, %v344_v36 }
 0x3a5   :  { %v429_v38 = vpop.f32.mrf.mxu1 }
 0x3a6   :  { %v430_v39 = vadd.f32 %v455_v37, %v429_v38 }
 0x3a7   :  { %v492_v40 = vpop.f32.mrf.mxu1 }
 0x3a8   :  { %433 = vst.msk [vmem:[#allocation2] sm:$0xff] %vm48_vm0, %v430_v39 }
 0x3a9   :  { %512 = shalt.err (!%p509_p4)
}
 0x3aa   :  { %443 = dma.vmem_to_hbm [thread:$0]  %s441_s30, 128, %s640_s9, [#allocation3]  }
 0x3ab   :  { %521 = dma.done.wait [#allocation3], 128  }
 0x3ac   :  { %522 = vsyncadd [#allocation3], 4294967168 }
 0x3ad   :  { %447 = vsyncpa [#allocation3], 1 }

</bundles_post_ra>
